<compile_context>
chip_gen: v7x
topology: tpu7x:2x2x1
jax: 0.10.0
libtpu: 0.0.40
codegen_flags: <defaults>
</compile_context>

<pallas_src>
import jax
import jax.numpy as jnp
from jax.experimental import pallas as pl
from jax.experimental.pallas import tpu as pltpu

_LANE = 128
_SUB = 8


def _p_kernel(gamma_ref, i_ref, q_ref, r_ref, o_ref):
    # gamma_ref: (1,) scalar in SMEM
    # i_ref, r_ref, o_ref: (1, C, row_tile, 128) VMEM tiles
    # q_ref:               (1, 1, row_tile, 128) VMEM tile (broadcast over C)
    gamma = gamma_ref[0]
    q = q_ref[...]
    # One exact reciprocal per spatial tile, reused for all C channels.
    inv_den = pl.reciprocal(gamma + q * q, approx=False)
    num = i_ref[...] * q + gamma * r_ref[...]
    o_ref[...] = (num * inv_den).astype(o_ref.dtype)


def p_solver(I, Q, R, gamma):
    """Computes (I * Q + gamma * R) / (gamma + Q * Q), Q broadcast over channels.

    I, R: (N, C, H, W) float32
    Q:    (N, 1, H, W) float32
    gamma: python / JAX scalar
    """
    N, C, H, W = I.shape
    assert Q.shape == (N, 1, H, W)
    assert R.shape == I.shape
    dtype = I.dtype
    HW = H * W

    # Pad the flattened spatial axis to a multiple of 8*128 so the 4-D view
    # (N, C, rows, 128) is dense in both sublanes and lanes.
    align = _SUB * _LANE
    HW_pad = ((HW + align - 1) // align) * align
    rows = HW_pad // _LANE

    I2 = I.reshape(N, C, HW)
    Q2 = Q.reshape(N, 1, HW)
    R2 = R.reshape(N, C, HW)
    if HW_pad != HW:
        pad = HW_pad - HW
        I2 = jnp.pad(I2, ((0, 0), (0, 0), (0, pad)))
        R2 = jnp.pad(R2, ((0, 0), (0, 0), (0, pad)))
        # Pad Q with 1.0 so the padded denominator stays > 0 even if gamma == 0.
        Q2 = jnp.pad(Q2, ((0, 0), (0, 0), (0, pad)), constant_values=1.0)

    I4 = I2.reshape(N, C, rows, _LANE)
    Q4 = Q2.reshape(N, 1, rows, _LANE)
    R4 = R2.reshape(N, C, rows, _LANE)
    gamma_arr = jnp.asarray(gamma, dtype=dtype).reshape(1)

    # ---- row_tile selection -------------------------------------------------
    # Target ~1 MiB for the I/R/O blocks: C * row_tile * 128 * 4 B ~= 1 MiB.
    bytes_per_elt = 4
    target_rows = (1 << 20) // (C * _LANE * bytes_per_elt)
    target_rows = max(_SUB, (target_rows // _SUB) * _SUB)

    # Keep enough grid steps for pipelining (>= ~8 total) and at least 2 steps
    # so v7x's two TensorCores both get work even when N == 1.
    min_steps = 8
    desired_nrow = max(2, -(-min_steps // N))           # ceil(min_steps / N)
    split_rows = -(-rows // desired_nrow)               # ceil(rows / desired_nrow)
    split_rows = max(_SUB, ((split_rows + _SUB - 1) // _SUB) * _SUB)

    row_tile = min(target_rows, split_rows, rows)
    row_tile = max(_SUB, (row_tile // _SUB) * _SUB)
    row_tile = min(row_tile, rows)
    n_row = pl.cdiv(rows, row_tile)

    img_spec = pl.BlockSpec((1, C, row_tile, _LANE), lambda n, j: (n, 0, j, 0))
    q_spec = pl.BlockSpec((1, 1, row_tile, _LANE), lambda n, j: (n, 0, j, 0))

    out4 = pl.pallas_call(
        _p_kernel,
        out_shape=jax.ShapeDtypeStruct((N, C, rows, _LANE), dtype),
        grid_spec=pl.GridSpec(
            grid=(N, n_row),
            in_specs=[
                pl.BlockSpec(memory_space=pltpu.MemorySpace.SMEM),  # gamma
                img_spec,   # I
                q_spec,     # Q (broadcast over C inside the kernel)
                img_spec,   # R
            ],
            out_specs=img_spec,
        ),
        compiler_params=pltpu.CompilerParams(
            dimension_semantics=("parallel", "parallel"),
        ),
    )(gamma_arr, I4, Q4, R4)

    out = out4.reshape(N, C, HW_pad)
    if HW_pad != HW:
        out = out[:, :, :HW]
    return out.reshape(N, C, H, W)


if __name__ == "__main__":
    key = jax.random.PRNGKey(0)
    k1, k2, k3 = jax.random.split(key, 3)

    N, C, H, W = 2, 3, 16, 16
    I = jax.random.uniform(k1, (N, C, H, W), dtype=jnp.float32)
    Q = jax.random.uniform(k2, (N, 1, H, W), dtype=jnp.float32) + 0.1
    R = jax.random.uniform(k3, (N, C, H, W), dtype=jnp.float32)
    gamma = 0.5

    out = p_solver(I, Q, R, gamma)
    out = jax.block_until_ready(out)

    # Pure-JAX reference (mirrors the PyTorch elementwise/broadcast semantics).
    ref = (I * Q + gamma * R) / (gamma + Q * Q)
    assert out.shape == (N, C, H, W)
    assert out.dtype == jnp.float32
    assert jnp.allclose(out, ref, atol=1e-6, rtol=1e-5)

    print("KERNEL_OK")
</pallas_src>

<mosaic_0001>
module attributes {stable_mosaic.version = 11 : i64} {
  func.func @_p_kernel(%arg0: i32, %arg1: i32, %arg2: memref<1xf32, #tpu.memory_space<smem>>, %arg3: memref<1x3x8x128xf32, #tpu.memory_space<vmem>>, %arg4: memref<1x1x8x128xf32, #tpu.memory_space<vmem>>, %arg5: memref<1x3x8x128xf32, #tpu.memory_space<vmem>>, %arg6: memref<1x3x8x128xf32, #tpu.memory_space<vmem>>) attributes {dimension_semantics = [#tpu.dimension_semantics<parallel>, #tpu.dimension_semantics<parallel>], iteration_bounds = array<i64: 2, 1>, scalar_prefetch = 0 : i64, scratch_operands = 0 : i64, tpu.core_type = #tpu.core_type<tc>, window_params = [{transform_indices = @transform_0, window_bounds = array<i64: 1>}, {transform_indices = @transform_1, window_bounds = array<i64: 1, 3, 8, 128>}, {transform_indices = @transform_2, window_bounds = array<i64: 1, 1, 8, 128>}, {transform_indices = @transform_3, window_bounds = array<i64: 1, 3, 8, 128>}, {transform_indices = @transform_4, window_bounds = array<i64: 1, 3, 8, 128>}]} {
    %c0 = arith.constant 0 : index
    %0 = memref.load %arg2[%c0] : memref<1xf32, #tpu.memory_space<smem>>
    %c0_0 = arith.constant 0 : index
    %c0_1 = arith.constant 0 : index
    %c0_2 = arith.constant 0 : index
    %c0_3 = arith.constant 0 : index
    %1 = vector.load %arg4[%c0_0, %c0_1, %c0_2, %c0_3] : memref<1x1x8x128xf32, #tpu.memory_space<vmem>>, vector<1x1x8x128xf32>
    %2 = arith.mulf %1, %1 : vector<1x1x8x128xf32>
    %3 = vector.broadcast %0 : f32 to vector<1x1x8x128xf32>
    %4 = arith.addf %3, %2 : vector<1x1x8x128xf32>
    %5 = tpu.reciprocal %4 : vector<1x1x8x128xf32> -> vector<1x1x8x128xf32>
    %c0_4 = arith.constant 0 : index
    %c0_5 = arith.constant 0 : index
    %c0_6 = arith.constant 0 : index
    %c0_7 = arith.constant 0 : index
    %6 = vector.load %arg3[%c0_4, %c0_5, %c0_6, %c0_7] : memref<1x3x8x128xf32, #tpu.memory_space<vmem>>, vector<1x3x8x128xf32>
    %7 = vector.broadcast %1 : vector<1x1x8x128xf32> to vector<1x3x8x128xf32>
    %8 = arith.mulf %6, %7 : vector<1x3x8x128xf32>
    %c0_8 = arith.constant 0 : index
    %c0_9 = arith.constant 0 : index
    %c0_10 = arith.constant 0 : index
    %c0_11 = arith.constant 0 : index
    %9 = vector.load %arg5[%c0_8, %c0_9, %c0_10, %c0_11] : memref<1x3x8x128xf32, #tpu.memory_space<vmem>>, vector<1x3x8x128xf32>
    %10 = vector.broadcast %0 : f32 to vector<1x3x8x128xf32>
    %11 = arith.mulf %10, %9 : vector<1x3x8x128xf32>
    %12 = arith.addf %8, %11 : vector<1x3x8x128xf32>
    %13 = vector.broadcast %5 : vector<1x1x8x128xf32> to vector<1x3x8x128xf32>
    %14 = arith.mulf %12, %13 : vector<1x3x8x128xf32>
    %c0_12 = arith.constant 0 : index
    %c0_13 = arith.constant 0 : index
    %c0_14 = arith.constant 0 : index
    %c0_15 = arith.constant 0 : index
    %15 = vector.load %arg6[%c0_12, %c0_13, %c0_14, %c0_15] : memref<1x3x8x128xf32, #tpu.memory_space<vmem>>, vector<1x3x8x128xf32>
    tpu.vector_store %arg6[%c0_12, %c0_13, %c0_14, %c0_15], %14 {strides = array<i32>} : memref<1x3x8x128xf32, #tpu.memory_space<vmem>>, vector<1x3x8x128xf32>,
    return
  }
  func.func @transform_0(%arg0: i32, %arg1: i32) -> i32 {
    %c0_i32 = arith.constant 0 : i32
    %c0_i32_0 = arith.constant 0 : i32
    return %c0_i32 : i32
  }
  func.func @transform_1(%arg0: i32, %arg1: i32) -> (i32, i32, i32, i32) {
    %c0_i32 = arith.constant 0 : i32
    %c0_i32_0 = arith.constant 0 : i32
    %c0_i32_1 = arith.constant 0 : i32
    return %arg0, %c0_i32, %arg1, %c0_i32_0 : i32, i32, i32, i32
  }
  func.func @transform_2(%arg0: i32, %arg1: i32) -> (i32, i32, i32, i32) {
    %c0_i32 = arith.constant 0 : i32
    %c0_i32_0 = arith.constant 0 : i32
    %c0_i32_1 = arith.constant 0 : i32
    return %arg0, %c0_i32, %arg1, %c0_i32_0 : i32, i32, i32, i32
  }
  func.func @transform_3(%arg0: i32, %arg1: i32) -> (i32, i32, i32, i32) {
    %c0_i32 = arith.constant 0 : i32
    %c0_i32_0 = arith.constant 0 : i32
    %c0_i32_1 = arith.constant 0 : i32
    return %arg0, %c0_i32, %arg1, %c0_i32_0 : i32, i32, i32, i32
  }
  func.func @transform_4(%arg0: i32, %arg1: i32) -> (i32, i32, i32, i32) {
    %c0_i32 = arith.constant 0 : i32
    %c0_i32_0 = arith.constant 0 : i32
    %c0_i32_1 = arith.constant 0 : i32
    return %arg0, %c0_i32, %arg1, %c0_i32_0 : i32, i32, i32, i32
  }
}

</mosaic_0001>

<bundles_post_ra>
// kernel: tpu_custom_call.1
= control target key start
LH: loop header
LB: loop body
LE: loop exit
PB: predicated region body
PF: predicated region fallthrough
CT: control target
= control target key end

     0   :  { %s1065_s0 = inlined_call_operand.<no memory space> [shape: f32[1], index: 0, kind: input, shape index: {}]   ;;  %s1066_s1 = inlined_call_operand.hbm [shape: f32[2,3,8,128], index: 1, kind: input, shape index: {}]   ;;  %s1067_s2 = inlined_call_operand.hbm [shape: f32[2,1,8,128], index: 2, kind: input, shape index: {}]   ;;  %s1068_s3 = inlined_call_operand.hbm [shape: f32[2,3,8,128], index: 3, kind: input, shape index: {}]   ;;  %s1069_s4 = inlined_call_operand.hbm [shape: f32[2,3,8,128], index: 4, kind: output, shape index: {}]  }
   0x1   :  { %1074 = sst [smem:[#allocation16_spill]] %s1067_s2 }
   0x2   :  { %9 = sst [smem:[#allocation2]] %s1065_s0 }
   0x3   :  { %10 = vsyncpa [#allocation4], 0 }
   0x4   :  { %12 = vsyncpa [#allocation4 + $0x1], 0 }
   0x5   :  { %13 = vsyncpa [#allocation7], 0 }
   0x6   :  { %15 = vsyncpa [#allocation7 + $0x1], 0 }
   0x7   :  { %16 = vsyncpa [#allocation5], 0 }
   0x8   :  { %18 = vsyncpa [#allocation5 + $0x1], 0  ;;  %s798_s17 = smov 0   ;;  %s800_s18 = smov 0  }
   0x9   :  { %s802_s19 = smov 0   ;;  %s804_s20 = smov 0  }
   0xa   :  { %s806_s21 = smov 0   ;;  %s808_s22 = smov 0  }
   0xb LB: > { %1075 = sst [smem:[#allocation13_spill]] %s756_s21  ;;  %s829_s0 = sadd.s32 4294967295, %s760_s22   ;;  %s760_s22 = sphi %s808_s22, %s24_s22   ;;  %s756_s21 = sphi %s806_s21, %s1093_s21   ;;  %s752_s20 = sphi %s804_s20, %s1092_s20   ;;  %s748_s19 = sphi %s802_s19, %s1096_s19   ;;  %s744_s18 = sphi %s800_s18, %s1095_s18   ;;  %s740_s17 = sphi %s798_s17, %s1094_s17  }
   0xc   : > { %s488_s23 = sadd.s32 4294967294, %s760_s22   ;;  %s36_s24 = sadd.s32 1, %s756_s21 }
   0xd   : > { %s66_s25 = sadd.s32 1, %s748_s19  ;;  %p38_p0 = scmp.ge.s32.totalorder %s36_s24, 2 }
   0xe   : > { %p73_p1 = scmp.ne.s32.totalorder %s748_s19, %s744_s18  ;;  %p74_p2 = scmp.eq.s32.totalorder %s760_s22, 0 }
   0xf   : > { %p79_p3 = scmp.ne.s32.totalorder %s744_s18, %s740_s17  ;;  %s1098_s24 = smov (%p38_p0, %s36_s24), 0 }
  0x10   : > { %1076 = sst [smem:[#allocation14_spill]] %s1098_s24  ;;  %p841_p4 = por %p74_p2, %p73_p1 }
  0x11   : > { %p80_p5 = scmp.eq.s32.totalorder %s829_s0, 0  ;;  %s61_s27 = ssub.s32 %s756_s21, %s1098_s24 }
  0x12   : > { %p161_p6 = scmp.eq.s32.totalorder %s829_s0, 1  ;;  %p64_p7 = scmp.eq.s32.totalorder %s61_s27, 0 }
  0x13   : > { %p849_p8 = por %p80_p5, %p79_p3  ;;  %p167_p10 = scmp.eq.s32.totalorder %s488_s23, 1 }
  0x14   : > { %p853_p9 = por %p161_p6, %p73_p1  ;;  %p528_p13 = scmp.lt.s32.totalorder %s760_s22, 2 }
  0x15   : > { %s1078_s28 = scalar_select %p849_p8, 1, 0 }
  0x16   : > { %s1079_s29 = scalar_select %p853_p9, 1, 0 }
  0x17   : > { %s858_s30 = scalar_select %p64_p7, %s748_s19, %s66_s25  }
  0x18   : > { %p860_p11 = por %p167_p10, %p79_p3  ;;  %s867_s6 = sand.u32 1, %s748_s19  }
  0x19   : > { %1080 = sst [smem:[#allocation15_spill]] %s858_s30  ;;  %s500_s7 = smul.u32 24, %s867_s6 }
  0x1a   : > { %s1081_s5 = scalar_select %p860_p11, 1, 0 }
  0x1b   : > { %s212_s8 = sand.u32 1, %s760_s22   ;;  %p873_p0 = pnand %p528_p13, %p841_p4 }
  0x1c   : > { %s492_s10 = sshll.u32 %s867_s6, 3  ;;  %s493_s11 = sshll.u32 %s756_s21, 7 }
  0x1d   : > { %s1083_s2 = sld [smem:[#allocation16_spill]]  ;;  %s216_s15 = scalar_lea.vmem [#allocation6], %s492_s10 }
  0x1e   : > { %s224_s16 = sshll.u32 %s216_s15, 4  ;;  %s886_s23 = scalar_lea.sflag [#allocation7], %s212_s8  ;;  %s884_s16 = int_to_ptr.vmem [resolvable:$true] %s224_s16 }
  0x1f   : > { %p892_p2 = pneg %p873_p0 }
  0x23   : > { %s882_s14 = scalar_lea.hbm %s1083_s2, %s493_s11  ;;  %s589_s10 = scalar_lea.hbm %s1083_s2, 256 }
  0x24   : > { %s584_s25 = scalar_lea.hbm %s882_s14, 128  ;;  %p590_p5 = scmp.lt.u32.totalorder %s882_s14, %s1083_s2 }
  0x25   : > { %p585_p1 = scmp.ne.s32.totalorder %s882_s14, %s584_s25  ;;  %p591_p6 = scmp.lt.u32.totalorder %s589_s10, %s584_s25 }
  0x26   : > { %p593_p10 = scmp.lt.u32.totalorder %s584_s25, %s882_s14 }
  0x27   : > { %p587_p3 = pnand %p892_p2, %p585_p1  ;;  %p592_p7 = por %p591_p6, %p590_p5 }
  0x29   : > { %p588_p4 = pneg %p587_p3  ;;  %p594_p13 = por %p593_p10, %p592_p7 }
  0x2b   : > { %p595_p12 = pnand %p594_p13, %p588_p4 }
  0x2d   : > { %598 = shalt.err (!%p595_p12)
}
  0x2e   : > { %s599_s8 = scalar_lea.vmem %s884_s16, 128  ;;  %s762_s15 = smov [#allocation6]  }
  0x2f   : > { %p600_p1 = scmp.ne.s32.totalorder %s884_s16, %s599_s8  ;;  %s604_s27 = sshll.u32 %s762_s15, 4  ;;  %s605_s27 = int_to_ptr.vmem [resolvable:$false] %s604_s27 }
  0x30   : > { %s606_s11 = scalar_lea.vmem %s605_s27, 256  ;;  %p607_p9 = scmp.lt.s32.totalorder %s884_s16, %s605_s27 }
  0x31   : > { %p602_p3 = pnand %p600_p1, %p892_p2  ;;  %p608_p8 = scmp.lt.s32.totalorder %s606_s11, %s599_s8 }
  0x33   : > { %p603_p11 = pneg %p602_p3  ;;  %p609_p5 = por %p608_p8, %p607_p9 }
  0x35   : > { %p610_p6 = pnand %p609_p5, %p603_p11 }
  0x37   : > { %613 = shalt.err (!%p610_p6)
}
  0x38   : > { %520 = dma.hbm_to_vmem [thread:$0]  (!%p873_p0), %s882_s14, 128, %s884_s16, %s886_s23  }
  0x39   : > { %s235_s25 = scalar_lea.vmem [#allocation8], %s500_s7  ;;  %p495_p12 = scmp.ge.s32.totalorder %s760_s22, 1 }
  0x3a   : > { %s243_s10 = sshll.u32 %s235_s25, 4  ;;  %p251_p8 = scmp.lt.s32.totalorder %s760_s22, 3  ;;  %s919_s10 = int_to_ptr.vmem [resolvable:$true] %s243_s10 }
  0x3b   : > { %s501_s13 = smul.u32 384, %s756_s21  ;;  %s194_s8 = scalar_lea.vmem [#allocation3], %s500_s7 }
  0x3c   : > { %p922_p9 = pnand %p495_p12, %p251_p8  ;;  %s202_s15 = sshll.u32 %s194_s8, 4  ;;  %s934_s15 = int_to_ptr.vmem [resolvable:$true] %s202_s15 }
  0x3d   : > { %s932_s14 = scalar_lea.hbm %s1066_s1, %s501_s13  ;;  %s939_s2 = scalar_lea.hbm %s1068_s3, %s501_s13 }
  0x3e   : > { %s1085_s12 = scalar_select %p922_p9, 1, 0 }
  0x3f   : > { %s191_s24 = scalar_lea.sflag [#allocation4], %s867_s6  ;;  %s614_s21 = scalar_lea.hbm %s932_s14, 384 }
  0x40   : > { %p615_p11 = scmp.ne.s32.totalorder %s932_s14, %s614_s21  ;;  %s619_s27 = scalar_lea.hbm %s1066_s1, 768 }
  0x41   : > { %p620_p10 = scmp.lt.u32.totalorder %s932_s14, %s1066_s1  ;;  %p621_p13 = scmp.lt.u32.totalorder %s619_s27, %s614_s21 }
  0x42   : > { %p617_p4 = pnand %p615_p11, %p892_p2  ;;  %p623_p3 = scmp.lt.u32.totalorder %s614_s21, %s932_s14 }
  0x43   : > { %p622_p1 = por %p621_p13, %p620_p10 }
  0x44   : > { %p618_p7 = pneg %p617_p4 }
  0x45   : > { %p624_p5 = por %p623_p3, %p622_p1 }
  0x47   : > { %p625_p6 = pnand %p624_p5, %p618_p7 }
  0x49   : > { %628 = shalt.err (!%p625_p6)
}
  0x4a   : > { %s629_s13 = scalar_lea.vmem %s934_s15, 384  ;;  %s763_s16 = smov [#allocation3]  }
  0x4b   : > { %p630_p12 = scmp.ne.s32.totalorder %s934_s15, %s629_s13  ;;  %s634_s25 = sshll.u32 %s763_s16, 4  ;;  %s635_s25 = int_to_ptr.vmem [resolvable:$false] %s634_s25 }
  0x4c   : > { %s636_s30 = scalar_lea.vmem %s635_s25, 768  ;;  %p637_p4 = scmp.lt.s32.totalorder %s934_s15, %s635_s25 }
  0x4d   : > { %p632_p8 = pnand %p630_p12, %p892_p2  ;;  %p638_p9 = scmp.lt.s32.totalorder %s636_s30, %s629_s13 }
  0x4f   : > { %p633_p11 = pneg %p632_p8  ;;  %p639_p10 = por %p638_p9, %p637_p4 }
  0x51   : > { %p640_p13 = pnand %p639_p10, %p633_p11 }
  0x53   : > { %643 = shalt.err (!%p640_p13)
}
  0x54   : > { %s764_s21 = smov 128   ;;  %s765_s7 = smov 8  }
  0x55   : > { %517 = dma.hbm_to_vmem [thread:$0]  (!%p873_p0), %s932_s14, 384, %s934_s15, %s191_s24, %s764_s21, %s764_s21, %s765_s7  }
  0x56   : > { %s644_s8 = scalar_lea.hbm %s939_s2, 384  ;;  %s649_s13 = scalar_lea.hbm %s1068_s3, 768 }
  0x57   : > { %p645_p9 = scmp.ne.s32.totalorder %s939_s2, %s644_s8  ;;  %p650_p3 = scmp.lt.u32.totalorder %s939_s2, %s1068_s3 }
  0x58   : > { %p651_p5 = scmp.lt.u32.totalorder %s649_s13, %s644_s8  ;;  %p653_p12 = scmp.lt.u32.totalorder %s644_s8, %s939_s2 }
  0x59   : > { %p647_p7 = pnand %p645_p9, %p892_p2 }
  0x5a   : > { %p652_p6 = por %p651_p5, %p650_p3 }
  0x5b   : > { %p648_p1 = pneg %p647_p7 }
  0x5c   : > { %p654_p8 = por %p653_p12, %p652_p6 }
  0x5e   : > { %p655_p11 = pnand %p654_p8, %p648_p1 }
  0x60   : > { %658 = shalt.err (!%p655_p11)
}
  0x61   : > { %s659_s24 = scalar_lea.vmem %s919_s10, 384  ;;  %s766_s6 = smov [#allocation8]  }
  0x62   : > { %p660_p4 = scmp.ne.s32.totalorder %s919_s10, %s659_s24  ;;  %s664_s15 = sshll.u32 %s766_s6, 4  ;;  %s665_s15 = int_to_ptr.vmem [resolvable:$false] %s664_s15 }
  0x63   : > { %s666_s14 = scalar_lea.vmem %s665_s15, 768  ;;  %p667_p9 = scmp.lt.s32.totalorder %s919_s10, %s665_s15 }
  0x64   : > { %p662_p10 = pnand %p660_p4, %p892_p2  ;;  %p668_p7 = scmp.lt.s32.totalorder %s666_s14, %s659_s24 }
  0x66   : > { %p663_p13 = pneg %p662_p10  ;;  %p669_p3 = por %p668_p7, %p667_p9 }
  0x68   : > { %p670_p5 = pnand %p669_p3, %p663_p13 }
  0x6a   : > { %673 = shalt.err (!%p670_p5)
}
  0x6b   : > { %523 = dma.hbm_to_vmem [thread:$0]  (!%p873_p0), %s939_s2, 384, %s919_s10, %s886_s23, %s764_s21, %s764_s21, %s765_s7  }
  0x6c   : > { %p1086_p2 = scmp.ne.s32.totalorder %s1085_s12, 0 }
  0x6d   : > { %s996_s26 = sand.u32 (!%p1086_p2), 1, %s744_s18   ;;  %p1087_p1 = scmp.ne.s32.totalorder (!%p1086_p2), %s1078_s28, 0 }
  0x6e   : > { %255 = sbr.rel (%p1086_p2) target bundleno = 159 (0x9f), region = 36  ;;  %s258_s8 = scalar_lea.sflag (!%p1086_p2), [#allocation4], %s996_s26 }
  0x6f   : > { %s504_s30 = smul.u32 (!%p1086_p2), 24, %s996_s26 }
  0x71   : > { %s261_s27 = scalar_lea.vmem (!%p1086_p2), [#allocation3], %s504_s30 }
  0x75   : > { %727 = dma.done.wait (%p1087_p1), %s258_s8, 384  }
  0x76   : > { %729 = vsyncadd (%p1087_p1), %s258_s8, 4294966912  ;;  %s266_s2 = sand.u32 1, %s829_s0   ;;  %s496_s9 = sshll.u32 %s996_s26, 3 }
  0x77   : > { %s267_s23 = scalar_lea.sflag [#allocation7], %s266_s2  ;;  %s270_s10 = scalar_lea.vmem [#allocation6], %s496_s9 }
  0x78   : > { %731 = dma.done.wait (%p1087_p1), %s267_s23, 512  }
  0x79   : > { %733 = vsyncadd (%p1087_p1), %s267_s23, 4294966784  ;;  %s314_s12 = sld [smem:[#allocation2]]  ;;  %v315_v0 = vld [vmem:[%s270_s10] sm:$0xff]  ;;  %s279_s21 = scalar_lea.vmem [#allocation8], %s504_s30  ;;  %v321_v6 = vld [vmem:[%s261_s27 + $0x8] sm:$0xff] }
  0x7a   : > { %v316_v2 = vmul.f32 %v315_v0, %v315_v0  ;;  %v320_v4 = vld [vmem:[%s261_s27] sm:$0xff]  ;;  %v327_v7 = vld [vmem:[%s279_s21 + $0x8] sm:$0xff]  ;;  %v322_v8 = vld [vmem:[%s261_s27 + $0x10] sm:$0xff]  ;;  %v324_v12 = vmul.f32 %v321_v6, %v315_v0  ;;  %s313_s0 = scalar_lea.vmem [#allocation9], %s504_s30  ;;  %s505_s7 = smul.u32 384, %s752_s20 }
  0x7b   : > { %v326_v5 = vld [vmem:[%s279_s21] sm:$0xff]  ;;  %v328_v9 = vld [vmem:[%s279_s21 + $0x10] sm:$0xff]  ;;  %v323_v10 = vmul.f32 %v320_v4, %v315_v0  ;;  %v325_v14 = vmul.f32 %v322_v8, %v315_v0  ;;  %s356_s28 = sshll.u32 %s313_s0, 4  ;;  %s342_s25 = scalar_lea.sflag [#allocation5], %s996_s26  ;;  %s1011_s28 = int_to_ptr.vmem [resolvable:$true] %s356_s28 }
  0x7c   : > { %s1016_s16 = scalar_lea.hbm %s1069_s4, %s505_s7  ;;  %s674_s24 = scalar_lea.vmem %s1011_s28, 384 }
  0x7d   : > { %p675_p0 = scmp.ne.s32.totalorder %s1011_s28, %s674_s24  ;;  %p1088_p6 = scmp.ne.s32.totalorder %s1079_s29, 0 }
  0x7e   : > { %s767_s20 = smov [#allocation9]  }
  0x7f   : > { %v317_v1 = vstv %s314_s12  ;;  %p676_p12 = pnand %p675_p0, %p1088_p6  ;;  %s678_s6 = sshll.u32 %s767_s20, 4  ;;  %s679_s6 = int_to_ptr.vmem [resolvable:$false] %s678_s6 }
  0x80   : > { %v318_v3 = vadd.f32 %v317_v1, %v316_v2  ;;  %v329_v11 = vmul.f32 %v326_v5, %v317_v1  ;;  %v330_v13 = vmul.f32 %v327_v7, %v317_v1  ;;  %v331_v15 = vmul.f32 %v328_v9, %v317_v1  ;;  %s680_s15 = scalar_lea.vmem %s679_s6, 768  ;;  %p681_p11 = scmp.lt.s32.totalorder %s1011_s28, %s679_s6 }
  0x81   : > { %p677_p8 = pneg %p676_p12  ;;  %p682_p4 = scmp.lt.s32.totalorder %s680_s15, %s674_s24 }
  0x82   : > { %582 = vrcp.f32 %v318_v3  ;;  %v332_v16 = vadd.f32 %v329_v11, %v323_v10  ;;  %v333_v17 = vadd.f32 %v330_v13, %v324_v12  ;;  %v334_v18 = vadd.f32 %v331_v15, %v325_v14 }
  0x83   : > { %p683_p10 = por %p682_p4, %p681_p11 }
  0x85   : > { %p684_p13 = pnand %p683_p10, %p677_p8 }
  0x8c   : > { %v583_v19 = vpop.eup %582 }
  0x8d   : > { %v335_v20 = vmul.f32 %v583_v19, %v332_v16  ;;  %v336_v21 = vmul.f32 %v583_v19, %v333_v17  ;;  %v337_v22 = vmul.f32 %v583_v19, %v334_v18 }
  0x8f   : > { %338 = vst [vmem:[%s313_s0] sm:$0xff] %v335_v20  ;;  %339 = vst [vmem:[%s313_s0 + $0x8] sm:$0xff] %v336_v21 }
  0x90   : > { %340 = vst [vmem:[%s313_s0 + $0x10] sm:$0xff] %v337_v22 }
  0x91   : > { %687 = shalt.err (!%p684_p13)
}
  0x92   : > { %s688_s14 = scalar_lea.hbm %s1016_s16, 384  ;;  %s692_s27 = scalar_lea.hbm %s1069_s4, 768 }
  0x93   : > { %p689_p9 = scmp.ne.s32.totalorder %s1016_s16, %s688_s14  ;;  %p693_p5 = scmp.lt.u32.totalorder %s1016_s16, %s1069_s4 }
  0x94   : > { %p694_p2 = scmp.lt.u32.totalorder %s692_s27, %s688_s14  ;;  %p696_p0 = scmp.lt.u32.totalorder %s688_s14, %s1016_s16 }
  0x95   : > { %p690_p7 = pnand %p689_p9, %p1088_p6 }
  0x96   : > { %p695_p1 = por %p694_p2, %p693_p5 }
  0x97   : > { %p691_p3 = pneg %p690_p7 }
  0x98   : > { %p697_p12 = por %p696_p0, %p695_p1 }
  0x9a   : > { %p698_p8 = pnand %p697_p12, %p691_p3 }
  0x9c   : > { %701 = shalt.err (!%p698_p8)
}
  0x9d   : > { %s768_s23 = smov 128   ;;  %s769_s10 = smov 8  }
  0x9e   : > { %512 = dma.vmem_to_hbm [thread:$0]  (%p1088_p6), %s1011_s28, 384, %s1016_s16, %s342_s25, %s768_s23, %s768_s23, %s769_s10  }
  0x9f PF: > { %s371_s12 = sand.u32 1, %s740_s17   ;;  %p1089_p11 = scmp.ne.s32.totalorder %s1081_s5, 0 }
  0xa0   : > { %p1090_p4 = scmp.ge.s32.totalorder %s760_s22, 2  ;;  %s372_s21 = scalar_lea.sflag [#allocation5], %s371_s12 }
  0xa2   : > { %p525_p10 = pnand %p1090_p4, %p1089_p11 }
  0xa4   : > { %735 = dma.done.wait (!%p525_p10), %s372_s21, 384  }
  0xa5   : > { %737 = vsyncadd (!%p525_p10), %s372_s21, 4294966912  ;;  %s24_s22 = sadd.s32 1, %s760_s22   ;;  %s1091_s0 = sld [smem:[#allocation15_spill]] }
  0xa6   : > { %p21_p13 = scmp.ge.s32.totalorder %s24_s22, 4   ;;  %s1092_s20 = sld [smem:[#allocation13_spill]] }
  0xa7   : > { %s1093_s21 = sld [smem:[#allocation14_spill]]  ;;  %s1094_s17 = smov %s744_s18 }
  0xa8   : > { %s1095_s18 = smov %s748_s19  ;;  %23 = sbr.rel (!%p21_p13) target bundleno = 11 (0xb), region = 105 }
  0xab   : > { %s1096_s19 = smov %s1091_s0 }
  0xaf   :  { %377 = vsyncpa [#allocation4], 1 }
  0xb0   :  { %379 = vsyncpa [#allocation4 + $0x1], 1 }
  0xb1   :  { %380 = vsyncpa [#allocation7], 1 }
  0xb2   :  { %382 = vsyncpa [#allocation7 + $0x1], 1 }
  0xb3   :  { %383 = vsyncpa [#allocation5], 1 }
  0xb4   :  { %385 = vsyncpa [#allocation5 + $0x1], 1 }

</bundles_post_ra>
